<compile_context>
chip_gen: v5e
topology: v5e:2x2
jax: 0.10.0
libtpu: 0.0.40
codegen_flags: <defaults>
</compile_context>

<pallas_src>
import functools

import jax
import jax.numpy as jnp
from jax.experimental import pallas as pl
from jax.experimental.pallas import tpu as pltpu


def encoder_kernel(x_ref, w1_ref, b1_ref, wh_ref, bh_ref, z_ref):
    # Hidden layer: Linear(784 -> 128) + Sigmoid (Dropout1d is identity in eval).
    h = jnp.dot(x_ref[...], w1_ref[...], preferred_element_type=jnp.float32)
    h = jax.nn.sigmoid(h + b1_ref[...])          # exp / reciprocal land on the EUP slot
    # Fused mean/variance head: wh = wm + wv*e, bh = bm + bv*e  (unpadded, (HID, z_dim)).
    z_ref[...] = (
        jnp.dot(h, wh_ref[...], preferred_element_type=jnp.float32) + bh_ref[...]
    )


def _round_up(n, m):
    return ((n + m - 1) // m) * m


@functools.partial(jax.jit, static_argnames=("tm",))
def encoder_forward(x, w1, b1, wm, bm, wv, bv, e, *, tm=None):
    """x: (B, 784) f32.  Returns z: (B, z_dim) f32 — identical math to v*e + u."""
    B, IN = x.shape
    HID = w1.shape[1]
    Z = wm.shape[1]

    # ---- Algebraic head fold (same math, reassociated): z = h @ (wm + wv*e) + (bm + bv*e)
    w_head = wm + wv * e            # (HID, Z)
    b_head = bm + bv * e            # (1, Z)

    # ---- Batch tiling.
    #   * mem-bound kernel -> biggest tile that fits VMEM comfortably (cap 1024: ~7 MB total,
    #     fine on v5e 16 MiB scoped / v7x 64 MiB / v6e 128 MiB).
    #   * when B > 8, force >= 2 grid steps so v7x's two TensorCores both get work.
    if tm is None:
        if B <= 8:
            tm = B
        else:
            tm = min(1024, _round_up(pl.cdiv(B, 2), 8))
    grid = (pl.cdiv(B, tm),)

    z = pl.pallas_call(
        encoder_kernel,
        out_shape=jax.ShapeDtypeStruct((B, Z), jnp.float32),
        grid_spec=pltpu.PrefetchScalarGridSpec(
            num_scalar_prefetch=0,
            grid=grid,
            in_specs=[
                pl.BlockSpec((tm, IN), lambda i: (i, 0)),    # x tile (batch-tiled, streamed)
                pl.BlockSpec((IN, HID), lambda i: (0, 0)),   # w1 (grid-invariant, resident)
                pl.BlockSpec((1, HID), lambda i: (0, 0)),    # b1 (resident)
                pl.BlockSpec((HID, Z), lambda i: (0, 0)),    # fused head weight (resident)
                pl.BlockSpec((1, Z), lambda i: (0, 0)),      # fused head bias   (resident)
            ],
            out_specs=pl.BlockSpec((tm, Z), lambda i: (i, 0)),  # direct (B, Z) writeback
        ),
        compiler_params=pltpu.CompilerParams(
            dimension_semantics=("parallel",),   # shard batch tiles across TCs (v7x)
        ),
    )(x, w1, b1, w_head, b_head)

    return z


def reference_forward(x, w1, b1, wm, bm, wv, bv, e):
    # Pure-JAX reference matching the PyTorch forward (un-fused heads).
    h = jax.nn.sigmoid(x @ w1 + b1)
    u = h @ wm + bm
    v = h @ wv + bv
    return v * e + u


if __name__ == "__main__":
    key = jax.random.PRNGKey(0)
    B, IN, HID, Z = 8, 784, 128, 16

    keys = jax.random.split(key, 8)
    x  = jax.random.normal(keys[0], (B, IN), dtype=jnp.float32)
    # Deterministic parameter init (scaled like PyTorch's Linear init).
    w1 = jax.random.uniform(keys[1], (IN, HID), jnp.float32, -1.0, 1.0) / jnp.sqrt(IN)
    b1 = jax.random.uniform(keys[2], (1, HID),  jnp.float32, -1.0, 1.0) / jnp.sqrt(IN)
    wm = jax.random.uniform(keys[3], (HID, Z),  jnp.float32, -1.0, 1.0) / jnp.sqrt(HID)
    bm = jax.random.uniform(keys[4], (1, Z),    jnp.float32, -1.0, 1.0) / jnp.sqrt(HID)
    wv = jax.random.uniform(keys[5], (HID, Z),  jnp.float32, -1.0, 1.0) / jnp.sqrt(HID)
    bv = jax.random.uniform(keys[6], (1, Z),    jnp.float32, -1.0, 1.0) / jnp.sqrt(HID)
    e  = jax.random.normal(keys[7], (1, Z), dtype=jnp.float32)  # fixed noise, like torch.randn((1, z_dim))

    z = encoder_forward(x, w1, b1, wm, bm, wv, bv, e)
    z = jax.block_until_ready(z)

    z_ref = reference_forward(x, w1, b1, wm, bm, wv, bv, e)
    assert z.shape == (B, Z)
    # Tolerance absorbs the (exact-math) head-fold reassociation in f32.
    assert jnp.allclose(z, z_ref, atol=1e-4, rtol=1e-4), "mismatch vs reference"

    print("KERNEL_OK")
</pallas_src>

<mosaic_0001>
module attributes {stable_mosaic.version = 11 : i64} {
  func.func @encoder_kernel(%arg0: i32, %arg1: memref<8x784xf32, #tpu.memory_space<vmem>>, %arg2: memref<784x128xf32, #tpu.memory_space<vmem>>, %arg3: memref<1x128xf32, #tpu.memory_space<vmem>>, %arg4: memref<128x16xf32, #tpu.memory_space<vmem>>, %arg5: memref<1x16xf32, #tpu.memory_space<vmem>>, %arg6: memref<8x16xf32, #tpu.memory_space<vmem>>) attributes {dimension_semantics = [#tpu.dimension_semantics<parallel>], iteration_bounds = array<i64: 1>, scalar_prefetch = 0 : i64, scratch_operands = 0 : i64, tpu.core_type = #tpu.core_type<tc>, window_params = [{transform_indices = @transform_0, window_bounds = array<i64: 8, 784>}, {pipeline_mode = #tpu.pipeline_mode<synchronous>, transform_indices = @transform_1, window_bounds = array<i64: 784, 128>}, {pipeline_mode = #tpu.pipeline_mode<synchronous>, transform_indices = @transform_2, window_bounds = array<i64: 1, 128>}, {pipeline_mode = #tpu.pipeline_mode<synchronous>, transform_indices = @transform_3, window_bounds = array<i64: 128, 16>}, {pipeline_mode = #tpu.pipeline_mode<synchronous>, transform_indices = @transform_4, window_bounds = array<i64: 1, 16>}, {transform_indices = @transform_5, window_bounds = array<i64: 8, 16>}]} {
    %c0 = arith.constant 0 : index
    %c0_0 = arith.constant 0 : index
    %0 = vector.load %arg1[%c0, %c0_0] : memref<8x784xf32, #tpu.memory_space<vmem>>, vector<8x784xf32>
    %c0_1 = arith.constant 0 : index
    %c0_2 = arith.constant 0 : index
    %1 = vector.load %arg2[%c0_1, %c0_2] : memref<784x128xf32, #tpu.memory_space<vmem>>, vector<784x128xf32>
    %cst = arith.constant dense<0.000000e+00> : vector<8x128xf32>
    %2 = tpu.matmul %0, %1, %cst {dimension_numbers = #tpu.dot_dimension_numbers<[1], [0], [0], [1], [0, 0, 1, 1], [], []>} : vector<8x784xf32>, vector<784x128xf32>, vector<8x128xf32> -> vector<8x128xf32>
    %c0_3 = arith.constant 0 : index
    %c0_4 = arith.constant 0 : index
    %3 = vector.load %arg3[%c0_3, %c0_4] : memref<1x128xf32, #tpu.memory_space<vmem>>, vector<1x128xf32>
    %4 = vector.broadcast %3 : vector<1x128xf32> to vector<8x128xf32>
    %5 = arith.addf %2, %4 : vector<8x128xf32>
    %6 = arith.negf %5 : vector<8x128xf32>
    %7 = math.exp %6 : vector<8x128xf32>
    %cst_5 = arith.constant 1.000000e+00 : f32
    %8 = vector.broadcast %cst_5 : f32 to vector<8x128xf32>
    %9 = arith.addf %8, %7 : vector<8x128xf32>
    %10 = arith.divf %8, %9 : vector<8x128xf32>
    %c0_6 = arith.constant 0 : index
    %c0_7 = arith.constant 0 : index
    %11 = vector.load %arg4[%c0_6, %c0_7] : memref<128x16xf32, #tpu.memory_space<vmem>>, vector<128x16xf32>
    %cst_8 = arith.constant dense<0.000000e+00> : vector<8x16xf32>
    %12 = tpu.matmul %10, %11, %cst_8 {dimension_numbers = #tpu.dot_dimension_numbers<[1], [0], [0], [1], [0, 0, 1, 1], [], []>} : vector<8x128xf32>, vector<128x16xf32>, vector<8x16xf32> -> vector<8x16xf32>
    %c0_9 = arith.constant 0 : index
    %c0_10 = arith.constant 0 : index
    %13 = vector.load %arg5[%c0_9, %c0_10] : memref<1x16xf32, #tpu.memory_space<vmem>>, vector<1x16xf32>
    %14 = vector.broadcast %13 : vector<1x16xf32> to vector<8x16xf32>
    %15 = arith.addf %12, %14 : vector<8x16xf32>
    %c0_11 = arith.constant 0 : index
    %c0_12 = arith.constant 0 : index
    %16 = vector.load %arg6[%c0_11, %c0_12] : memref<8x16xf32, #tpu.memory_space<vmem>>, vector<8x16xf32>
    tpu.vector_store %arg6[%c0_11, %c0_12], %15 {strides = array<i32>} : memref<8x16xf32, #tpu.memory_space<vmem>>, vector<8x16xf32>,
    return
  }
  func.func @transform_0(%arg0: i32) -> (i32, i32) {
    %c0_i32 = arith.constant 0 : i32
    %c0_i32_0 = arith.constant 0 : i32
    return %arg0, %c0_i32 : i32, i32
  }
  func.func @transform_1(%arg0: i32) -> (i32, i32) {
    %c0_i32 = arith.constant 0 : i32
    %c0_i32_0 = arith.constant 0 : i32
    %c0_i32_1 = arith.constant 0 : i32
    return %c0_i32, %c0_i32_0 : i32, i32
  }
  func.func @transform_2(%arg0: i32) -> (i32, i32) {
    %c0_i32 = arith.constant 0 : i32
    %c0_i32_0 = arith.constant 0 : i32
    %c0_i32_1 = arith.constant 0 : i32
    return %c0_i32, %c0_i32_0 : i32, i32
  }
  func.func @transform_3(%arg0: i32) -> (i32, i32) {
    %c0_i32 = arith.constant 0 : i32
    %c0_i32_0 = arith.constant 0 : i32
    %c0_i32_1 = arith.constant 0 : i32
    return %c0_i32, %c0_i32_0 : i32, i32
  }
  func.func @transform_4(%arg0: i32) -> (i32, i32) {
    %c0_i32 = arith.constant 0 : i32
    %c0_i32_0 = arith.constant 0 : i32
    %c0_i32_1 = arith.constant 0 : i32
    return %c0_i32, %c0_i32_0 : i32, i32
  }
  func.func @transform_5(%arg0: i32) -> (i32, i32) {
    %c0_i32 = arith.constant 0 : i32
    %c0_i32_0 = arith.constant 0 : i32
    return %arg0, %c0_i32 : i32, i32
  }
}

</mosaic_0001>

<bundles_post_ra>
// kernel: encoder_forward.1
= control target key start
LH: loop header
LB: loop body
LE: loop exit
PB: predicated region body
PF: predicated region fallthrough
CT: control target
= control target key end

     0   :  { %10 = vsyncpa [#allocation3], 0  ;;  %s548_s0 = inlined_call_operand.vmem [shape: f32[8,784], index: 0, kind: input, shape index: {}]   ;;  %s549_s1 = inlined_call_operand.hbm [shape: f32[784,128], index: 1, kind: input, shape index: {}]   ;;  %s550_s2 = inlined_call_operand.vmem [shape: f32[1,128], index: 2, kind: input, shape index: {}]   ;;  %s551_s3 = inlined_call_operand.vmem [shape: f32[128,16], index: 3, kind: input, shape index: {}]   ;;  %s552_s4 = inlined_call_operand.vmem [shape: f32[1,16], index: 4, kind: input, shape index: {}]   ;;  %s553_s5 = inlined_call_operand.hbm [shape: f32[8,16], index: 5, kind: output, shape index: {}]  }
   0x1   :  { %11 = vsyncpa [#allocation4], 0  ;;  %s18_s20 = sshll.u32 %s549_s1, 4  ;;  %s431_s21 = smov [#allocation2]   ;;  %s19_s20 = int_to_ptr.hbm [resolvable:$true] %s18_s20 }
   0x2   :  { %s20_s22 = sshll.u32 %s431_s21, 4  ;;  %s432_s23 = smov 128   ;;  %s21_s22 = int_to_ptr.vmem [resolvable:$true] %s20_s22 }
   0x3   :  { %s433_s24 = smov 8  }
   0x4   :  { %26 = dma.hbm_to_vmem [thread:$0]  %s19_s20, 12544, %s21_s22, [#allocation3], %s432_s23, %s432_s23, %s433_s24  }
   0x5   :  { %427 = dma.done.wait [#allocation3], 12544  }
   0x6   :  { %428 = vsyncadd [#allocation3], 4294954752  ;;  %v59_v0 = vld [vmem:[#allocation2 + $0x78] sm:$0xff]  ;;  %v58_v1 = vld [vmem:[#allocation2 + $0x70] sm:$0xff]  ;;  %vm146_vm0 = vcmask 130048   ;;  %s434_s19 = smov [#allocation5]  }
   0x7   :  { %v75_v2 = vld [vmem:[#allocation2 + $0xf8] sm:$0xff]  ;;  %150 = vmatpush.msra.mxu0 %v59_v0  ;;  %v74_v3 = vld [vmem:[#allocation2 + $0xf0] sm:$0xff]  ;;  %v57_v4 = vld [vmem:[#allocation2 + $0x68] sm:$0xff]  ;;  %s355_s20 = sshll.u32 %s434_s19, 4  ;;  %s357_s23 = sshll.u32 %s553_s5, 4  ;;  %s356_s20 = int_to_ptr.vmem [resolvable:$true] %s355_s20  ;;  %s358_s23 = int_to_ptr.hbm [resolvable:$true] %s357_s23 }
   0x8   :  { %170 = vmatpush.msra.mxu1 %v75_v2  ;;  %v73_v5 = vld [vmem:[#allocation2 + $0xe8] sm:$0xff]  ;;  %v56_v6 = vld [vmem:[#allocation2 + $0x60] sm:$0xff]  ;;  %v55_v8 = vld [vmem:[#allocation2 + $0x58] sm:$0xff] }
   0x9   :  { %151 = vmatpush.msra.mxu0 %v58_v1  ;;  %v72_v7 = vld [vmem:[#allocation2 + $0xe0] sm:$0xff]  ;;  %v71_v9 = vld [vmem:[#allocation2 + $0xd8] sm:$0xff]  ;;  %v54_v10 = vld [vmem:[#allocation2 + $0x50] sm:$0xff] }
   0xa   :  { %171 = vmatpush.msra.mxu1 %v74_v3  ;;  %v91_v11 = vld [vmem:[#allocation2 + $0x178] sm:$0xff]  ;;  %v70_v12 = vld [vmem:[#allocation2 + $0xd0] sm:$0xff]  ;;  %v89_v15 = vld [vmem:[#allocation2 + $0x168] sm:$0xff] }
   0xb   :  { %152 = vmatpush.msra.mxu0 %v57_v4  ;;  %190 = vmatpush.msra.mxu2 %v91_v11  ;;  %v90_v13 = vld [vmem:[#allocation2 + $0x170] sm:$0xff]  ;;  %v107_v14 = vld [vmem:[#allocation2 + $0x1f8] sm:$0xff]  ;;  %v53_v17 = vld [vmem:[#allocation2 + $0x48] sm:$0xff] }
   0xc   :  { %172 = vmatpush.msra.mxu1 %v73_v5  ;;  %v106_v16 = vld [vmem:[#allocation2 + $0x1f0] sm:$0xff]  ;;  %v69_v18 = vld [vmem:[#allocation2 + $0xc8] sm:$0xff]  ;;  %210 = vmatpush.msra.mxu3 %v107_v14  ;;  %v88_v19 = vld [vmem:[#allocation2 + $0x160] sm:$0xff] }
   0xd   :  { %153 = vmatpush.msra.mxu0 %v56_v6  ;;  %191 = vmatpush.msra.mxu2 %v90_v13  ;;  %v105_v20 = vld [vmem:[#allocation2 + $0x1e8] sm:$0xff]  ;;  %v52_v21 = vld [vmem:[#allocation2 + $0x40] sm:$0xff]  ;;  %v87_v23 = vld [vmem:[#allocation2 + $0x158] sm:$0xff] }
   0xe   :  { %173 = vmatpush.msra.mxu1 %v72_v7  ;;  %v68_v22 = vld [vmem:[#allocation2 + $0xc0] sm:$0xff]  ;;  %211 = vmatpush.msra.mxu3 %v106_v16  ;;  %v51_v25 = vld [vmem:[#allocation2 + $0x38] sm:$0xff]  ;;  %v86_v27 = vld [vmem:[#allocation2 + $0x150] sm:$0xff] }
   0xf   :  { %154 = vmatpush.msra.mxu0 %v55_v8  ;;  %192 = vmatpush.msra.mxu2 %v89_v15  ;;  %v104_v24 = vld [vmem:[#allocation2 + $0x1e0] sm:$0xff]  ;;  %v67_v26 = vld [vmem:[#allocation2 + $0xb8] sm:$0xff]  ;;  %v50_v29 = vld [vmem:[#allocation2 + $0x30] sm:$0xff] }
  0x10   :  { %174 = vmatpush.msra.mxu1 %v71_v9  ;;  %212 = vmatpush.msra.mxu3 %v105_v20  ;;  %v103_v28 = vld [vmem:[#allocation2 + $0x1d8] sm:$0xff]  ;;  %v66_v30 = vld [vmem:[#allocation2 + $0xb0] sm:$0xff]  ;;  %v85_v31 = vld [vmem:[#allocation2 + $0x148] sm:$0xff] }
  0x11   :  { %155 = vmatpush.msra.mxu0 %v54_v10  ;;  %193 = vmatpush.msra.mxu2 %v88_v19  ;;  %v102_v32 = vld [vmem:[#allocation2 + $0x1d0] sm:$0xff]  ;;  %v49_v33 = vld [vmem:[#allocation2 + $0x28] sm:$0xff]  ;;  %v84_v35 = vld [vmem:[#allocation2 + $0x140] sm:$0xff] }
  0x12   :  { %175 = vmatpush.msra.mxu1 %v70_v12  ;;  %213 = vmatpush.msra.mxu3 %v104_v24  ;;  %v65_v34 = vld [vmem:[#allocation2 + $0xa8] sm:$0xff]  ;;  %v48_v37 = vld [vmem:[#allocation2 + $0x20] sm:$0xff]  ;;  %v83_v39 = vld [vmem:[#allocation2 + $0x138] sm:$0xff] }
  0x13   :  { %156 = vmatpush.msra.mxu0 %v53_v17  ;;  %194 = vmatpush.msra.mxu2 %v87_v23  ;;  %v101_v36 = vld [vmem:[#allocation2 + $0x1c8] sm:$0xff]  ;;  %v64_v38 = vld [vmem:[#allocation2 + $0xa0] sm:$0xff]  ;;  %v47_v41 = vld [vmem:[#allocation2 + $0x18] sm:$0xff] }
  0x14   :  { %176 = vmatpush.msra.mxu1 %v69_v18  ;;  %214 = vmatpush.msra.mxu3 %v103_v28  ;;  %v100_v40 = vld [vmem:[#allocation2 + $0x1c0] sm:$0xff]  ;;  %v63_v42 = vld [vmem:[#allocation2 + $0x98] sm:$0xff]  ;;  %v82_v43 = vld [vmem:[#allocation2 + $0x130] sm:$0xff] }
  0x15   :  { %157 = vmatpush.msra.mxu0 %v52_v21  ;;  %195 = vmatpush.msra.mxu2 %v86_v27  ;;  %v99_v44 = vld [vmem:[#allocation2 + $0x1b8] sm:$0xff]  ;;  %v46_v45 = vld [vmem:[#allocation2 + $0x10] sm:$0xff]  ;;  %v81_v47 = vld [vmem:[#allocation2 + $0x128] sm:$0xff] }
  0x16   :  { %177 = vmatpush.msra.mxu1 %v68_v22  ;;  %215 = vmatpush.msra.mxu3 %v102_v32  ;;  %v62_v46 = vld [vmem:[#allocation2 + $0x90] sm:$0xff]  ;;  %v45_v49 = vld [vmem:[#allocation2 + $0x8] sm:$0xff]  ;;  %v80_v51 = vld [vmem:[#allocation2 + $0x120] sm:$0xff] }
  0x17   :  { %158 = vmatpush.msra.mxu0 %v51_v25  ;;  %196 = vmatpush.msra.mxu2 %v85_v31  ;;  %v98_v48 = vld [vmem:[#allocation2 + $0x1b0] sm:$0xff]  ;;  %v61_v50 = vld [vmem:[#allocation2 + $0x88] sm:$0xff]  ;;  %v44_v53 = vld [vmem:[#allocation2] sm:$0xff] }
  0x18   :  { %178 = vmatpush.msra.mxu1 %v67_v26  ;;  %216 = vmatpush.msra.mxu3 %v101_v36  ;;  %v97_v52 = vld [vmem:[#allocation2 + $0x1a8] sm:$0xff]  ;;  %v60_v54 = vld [vmem:[#allocation2 + $0x80] sm:$0xff]  ;;  %v123_v55 = vld [vmem:[#allocation2 + $0x278] sm:$0xff] }
  0x19   :  { %159 = vmatpush.msra.mxu0 %v50_v29  ;;  %197 = vmatpush.msra.mxu2 %v84_v35  ;;  %v139_v56 = vld [vmem:[#allocation2 + $0x2f8] sm:$0xff]  ;;  %v96_v58 = vld [vmem:[#allocation2 + $0x1a0] sm:$0xff]  ;;  %v122_v59 = vld [vmem:[#allocation2 + $0x270] sm:$0xff] }
  0x1a   :  { %179 = vmatpush.msra.mxu1 %v66_v30  ;;  %217 = vmatpush.msra.mxu3 %v100_v40  ;;  %v79_v57 = vld [vmem:[#allocation2 + $0x118] sm:$0xff]  ;;  %v138_v60 = vld [vmem:[#allocation2 + $0x2f0] sm:$0xff]  ;;  %v121_v63 = vld [vmem:[#allocation2 + $0x268] sm:$0xff] }
  0x1b   :  { %160 = vmatpush.msra.mxu0 %v49_v33  ;;  %198 = vmatpush.msra.mxu2 %v83_v39  ;;  %v78_v61 = vld [vmem:[#allocation2 + $0x110] sm:$0xff]  ;;  %v95_v62 = vld [vmem:[#allocation2 + $0x198] sm:$0xff]  ;;  %v137_v0 = vld [vmem:[#allocation2 + $0x2e8] sm:$0xff] }
  0x1c   :  { %180 = vmatpush.msra.mxu1 %v65_v34  ;;  %218 = vmatpush.msra.mxu3 %v99_v44  ;;  %v120_v1 = vld [vmem:[#allocation2 + $0x260] sm:$0xff]  ;;  %v77_v2 = vld [vmem:[#allocation2 + $0x108] sm:$0xff]  ;;  %v94_v3 = vld [vmem:[#allocation2 + $0x190] sm:$0xff] }
  0x1d   :  { %161 = vmatpush.msra.mxu0 %v48_v37  ;;  %199 = vmatpush.msra.mxu2 %v82_v43  ;;  %v136_v4 = vld [vmem:[#allocation2 + $0x2e0] sm:$0xff]  ;;  %v93_v6 = vld [vmem:[#allocation2 + $0x188] sm:$0xff]  ;;  %v119_v7 = vld [vmem:[#allocation2 + $0x258] sm:$0xff] }
  0x1e   :  { %181 = vmatpush.msra.mxu1 %v64_v38  ;;  %219 = vmatpush.msra.mxu3 %v98_v48  ;;  %v76_v5 = vld [vmem:[#allocation2 + $0x100] sm:$0xff]  ;;  %v135_v8 = vld [vmem:[#allocation2 + $0x2d8] sm:$0xff]  ;;  %v39_v9 = vld [vmem:[%s548_s0 + $0x10] sm:$0xff] }
  0x1f   :  { %162 = vmatpush.msra.mxu0 %v47_v41  ;;  %200 = vmatpush.msra.mxu2 %v81_v47  ;;  %v92_v10 = vld [vmem:[#allocation2 + $0x180] sm:$0xff]  ;;  %v118_v11 = vld [vmem:[#allocation2 + $0x250] sm:$0xff]  ;;  %v141_v13 = vld [vmem:[#allocation2 + $0x308] sm:$0xff] }
  0x20   :  { %182 = vmatpush.msra.mxu1 %v63_v42  ;;  %220 = vmatpush.msra.mxu3 %v97_v52  ;;  %v134_v12 = vld [vmem:[#allocation2 + $0x2d0] sm:$0xff]  ;;  %v37_v14 = vld [vmem:[%s548_s0] sm:$0xff]  ;;  %v117_v15 = vld [vmem:[#allocation2 + $0x248] sm:$0xff] }
  0x21   :  { %163 = vmatpush.msra.mxu0 %v46_v45  ;;  %201 = vmatpush.msra.mxu2 %v80_v51  ;;  %v133_v16 = vld [vmem:[#allocation2 + $0x2c8] sm:$0xff]  ;;  %v40_v17 = vld [vmem:[%s548_s0 + $0x18] sm:$0xff]  ;;  %v116_v19 = vld [vmem:[#allocation2 + $0x240] sm:$0xff] }
  0x22   :  { %183 = vmatpush.msra.mxu1 %v62_v46  ;;  %221 = vmatpush.msra.mxu3 %v96_v58  ;;  %v38_v18 = vld [vmem:[%s548_s0 + $0x8] sm:$0xff]  ;;  %v132_v20 = vld [vmem:[#allocation2 + $0x2c0] sm:$0xff]  ;;  %v115_v22 = vld [vmem:[#allocation2 + $0x238] sm:$0xff] }
  0x23   :  { %164 = vmatpush.msra.mxu0 %v45_v49  ;;  %202 = vmatpush.msra.mxu2 %v79_v57  ;;  %v140_v21 = vld [vmem:[#allocation2 + $0x300] sm:$0xff]  ;;  %v131_v23 = vld [vmem:[#allocation2 + $0x2b8] sm:$0xff]  ;;  %v43_v24 = vld [vmem:[%s548_s0 + $0x30] sm:$0xff] }
  0x24   :  { %184 = vmatpush.msra.mxu1 %v61_v50  ;;  %222 = vmatpush.msra.mxu3 %v95_v62  ;;  %v114_v25 = vld [vmem:[#allocation2 + $0x230] sm:$0xff]  ;;  %v113_v27 = vld [vmem:[#allocation2 + $0x228] sm:$0xff]  ;;  %v112_v29 = vld [vmem:[#allocation2 + $0x220] sm:$0xff] }
  0x25   :  { %165 = vmatpush.msra.mxu0 %v44_v53  ;;  %203 = vmatpush.msra.mxu2 %v78_v61  ;;  %v130_v26 = vld [vmem:[#allocation2 + $0x2b0] sm:$0xff]  ;;  %v129_v28 = vld [vmem:[#allocation2 + $0x2a8] sm:$0xff]  ;;  %v128_v30 = vld [vmem:[#allocation2 + $0x2a0] sm:$0xff] }
  0x26   :  { %185 = vmatpush.msra.mxu1 %v60_v54  ;;  %223 = vmatpush.msra.mxu3 %v94_v3  ;;  %v111_v31 = vld [vmem:[#allocation2 + $0x218] sm:$0xff]  ;;  %v110_v33 = vld [vmem:[#allocation2 + $0x210] sm:$0xff]  ;;  %v109_v35 = vld [vmem:[#allocation2 + $0x208] sm:$0xff] }
  0x27   :  { %230 = vmatpush.msrb.mxu0 %v123_v55  ;;  %204 = vmatpush.msra.mxu2 %v77_v2  ;;  %v127_v32 = vld [vmem:[#allocation2 + $0x298] sm:$0xff]  ;;  %v126_v34 = vld [vmem:[#allocation2 + $0x290] sm:$0xff]  ;;  %v125_v36 = vld [vmem:[#allocation2 + $0x288] sm:$0xff] }
  0x28   :  { %250 = vmatpush.msrb.mxu1 %v139_v56  ;;  %224 = vmatpush.msra.mxu3 %v93_v6  ;;  %v108_v37 = vld [vmem:[#allocation2 + $0x200] sm:$0xff]  ;;  %v42_v40 = vld [vmem:[%s548_s0 + $0x28] sm:$0xff]  ;;  %v324_v41 = vld [vmem:[%s551_s3 + $0x78] sm:$0xff] }
  0x29   :  { %231 = vmatpush.msrb.mxu0 %v122_v59  ;;  %205 = vmatpush.msra.mxu2 %v76_v5  ;;  %v124_v38 = vld [vmem:[#allocation2 + $0x280] sm:$0xff]  ;;  %v323_v42 = vld [vmem:[%s551_s3 + $0x70] sm:$0xff]  ;;  %v322_v43 = vld [vmem:[%s551_s3 + $0x68] sm:$0xff] }
  0x2a   :  { %251 = vmatpush.msrb.mxu1 %v138_v60  ;;  %206 = vmatmul.f32.vlgmr.msra.gmra.mxu2 %v39_v9  ;;  %v41_v39 = vld [vmem:[%s548_s0 + $0x20] sm:$0xff]  ;;  %v320_v45 = vld [vmem:[%s551_s3 + $0x58] sm:$0xff]  ;;  %v319_v47 = vld [vmem:[%s551_s3 + $0x50] sm:$0xff] }
  0x2b   :  { %232 = vmatpush.msrb.mxu0 %v121_v63  ;;  %225 = vmatpush.msra.mxu3 %v92_v10  ;;  %v321_v44 = vld [vmem:[%s551_s3 + $0x60] sm:$0xff]  ;;  %v318_v49 = vld [vmem:[%s551_s3 + $0x48] sm:$0xff]  ;;  %v316_v53 = vld [vmem:[%s551_s3 + $0x38] sm:$0xff] }
  0x2c   :  { %252 = vmatpush.msrb.mxu1 %v137_v0  ;;  %284 = vmatpush.msrb.mxu2 %v141_v13  ;;  %v373_v46 = vld [vmem:[%s550_s2] ss:$0 sm:$0xff]  ;;  %v315_v54 = vld [vmem:[%s551_s3 + $0x30] sm:$0xff]  ;;  %v314_v56 = vld [vmem:[%s551_s3 + $0x28] sm:$0xff] }
  0x2d   :  { %233 = vmatpush.msrb.mxu0 %v120_v1  ;;  %226 = vmatmul.f32.vlgmr.msra.gmra.mxu3 %v40_v17  ;;  %v317_v51 = vld [vmem:[%s551_s3 + $0x40] sm:$0xff]  ;;  %v312_v60 = vld [vmem:[%s551_s3 + $0x18] sm:$0xff]  ;;  %v311_v62 = vld [vmem:[%s551_s3 + $0x10] sm:$0xff] }
  0x2e   :  { %253 = vmatpush.msrb.mxu1 %v136_v4  ;;  %166 = vmatmul.f32.vlgmr.msra.gmra.mxu0 %v37_v14  ;;  %v313_v58 = vld [vmem:[%s551_s3 + $0x20] sm:$0xff]  ;;  %v310_v0 = vld [vmem:[%s551_s3 + $0x8] sm:$0xff] }
  0x2f   :  { %234 = vmatpush.msrb.mxu0 %v119_v7  ;;  %186 = vmatmul.f32.vlgmr.msra.gmra.mxu1 %v38_v18  ;;  %v309_v1 = vld [vmem:[%s551_s3] sm:$0xff] }
  0x30   :  { %254 = vmatpush.msrb.mxu1 %v135_v8  ;;  %285 = vmatpush.msrb.mxu2 %v140_v21  ;;  %v374_v21 = vld [vmem:[%s552_s4] ss:$0 sm:$0xff] }
  0x31   :  { %235 = vmatpush.msrb.mxu0 %v118_v11  ;;  %329 = vmatpush.msrb.mxu3 %v324_v41 }
  0x32   :  { %255 = vmatpush.msrb.mxu1 %v134_v12  ;;  %367 = vmatmul.msk.f32.vlgmr.msrb.gmra.mxu2 %vm146_vm0, %v43_v24 }
  0x33   :  { %236 = vmatpush.msrb.mxu0 %v117_v15  ;;  %330 = vmatpush.msrb.mxu3 %v323_v42 }
  0x34   :  { %256 = vmatpush.msrb.mxu1 %v133_v16 }
  0x35   :  { %237 = vmatpush.msrb.mxu0 %v116_v19  ;;  %331 = vmatpush.msrb.mxu3 %v322_v43 }
  0x36   :  { %257 = vmatpush.msrb.mxu1 %v132_v20 }
  0x37   :  { %238 = vmatpush.msrb.mxu0 %v115_v22  ;;  %332 = vmatpush.msrb.mxu3 %v321_v44 }
  0x38   :  { %258 = vmatpush.msrb.mxu1 %v131_v23 }
  0x39   :  { %239 = vmatpush.msrb.mxu0 %v114_v25  ;;  %333 = vmatpush.msrb.mxu3 %v320_v45 }
  0x3a   :  { %259 = vmatpush.msrb.mxu1 %v130_v26 }
  0x3b   :  { %240 = vmatpush.msrb.mxu0 %v113_v27  ;;  %334 = vmatpush.msrb.mxu3 %v319_v47 }
  0x3c   :  { %260 = vmatpush.msrb.mxu1 %v129_v28 }
  0x3d   :  { %241 = vmatpush.msrb.mxu0 %v112_v29  ;;  %335 = vmatpush.msrb.mxu3 %v318_v49 }
  0x3e   :  { %261 = vmatpush.msrb.mxu1 %v128_v30 }
  0x3f   :  { %242 = vmatpush.msrb.mxu0 %v111_v31  ;;  %336 = vmatpush.msrb.mxu3 %v317_v51 }
  0x40   :  { %262 = vmatpush.msrb.mxu1 %v127_v32 }
  0x41   :  { %243 = vmatpush.msrb.mxu0 %v110_v33  ;;  %337 = vmatpush.msrb.mxu3 %v316_v53 }
  0x42   :  { %263 = vmatpush.msrb.mxu1 %v126_v34 }
  0x43   :  { %244 = vmatpush.msrb.mxu0 %v109_v35  ;;  %338 = vmatpush.msrb.mxu3 %v315_v54 }
  0x44   :  { %264 = vmatpush.msrb.mxu1 %v125_v36 }
  0x45   :  { %245 = vmatpush.msrb.mxu0 %v108_v37  ;;  %339 = vmatpush.msrb.mxu3 %v314_v56 }
  0x46   :  { %265 = vmatpush.msrb.mxu1 %v124_v38  ;;  %246 = vmatmul.f32.vlgmr.msrb.gmra.mxu0 %v41_v39 }
  0x47   :  { %266 = vmatmul.f32.vlgmr.msrb.gmra.mxu1 %v42_v40  ;;  %340 = vmatpush.msrb.mxu3 %v313_v58 }
  0x49   :  { %341 = vmatpush.msrb.mxu3 %v312_v60 }
  0x4b   :  { %342 = vmatpush.msrb.mxu3 %v311_v62 }
  0x4d   :  { %343 = vmatpush.msrb.mxu3 %v310_v0 }
  0x4f   :  { %344 = vmatpush.msrb.mxu3 %v309_v1 }
  0xab   :  { %v167_v48 = vpop.f32.mrf.mxu0 }
  0xac   :  { %v168_v50 = vadd.f32 %v373_v46, %v167_v48  ;;  %v187_v52 = vpop.f32.mrf.mxu1 }
  0xad   :  { %v207_v57 = vpop.f32.mrf.mxu2 }
  0xae   :  { %v188_v55 = vadd.f32 %v187_v52, %v168_v50 }
  0xb0   :  { %v208_v59 = vadd.f32 %v207_v57, %v188_v55  ;;  %v227_v61 = vpop.f32.mrf.mxu3 }
  0xb2   :  { %v228_v63 = vadd.f32 %v227_v61, %v208_v59 }
  0xb5   :  { %v287_v5 = vpop.f32.mrf.mxu2 }
  0xc3   :  { %v247_v2 = vpop.f32.mrf.mxu0 }
  0xc4   :  { %v267_v3 = vpop.f32.mrf.mxu1  ;;  %v248_v4 = vadd.f32 %v247_v2, %v228_v63 }
  0xc6   :  { %v268_v6 = vadd.f32 %v267_v3, %v248_v4 }
  0xc8   :  { %v288_v7 = vadd.f32 %v287_v5, %v268_v6 }
  0xca   :  { %v368_v8 = vmul.f32 -1.442695, %v288_v7 }
  0xcc   :  { %375 = vpow2.f32 %v368_v8 }
  0xd2   :  { %v376_v9 = vpop.eup %375 }
  0xd3   :  { %v293_v10 = vadd.f32 1.0, %v376_v9 }
  0xd5   :  { %377 = vrcp.f32 %v293_v10  ;;  %v305_v14 = vand.u32 2147483648, %v293_v10  ;;  %v303_v16 = vand.u32 2147483647, %v293_v10  ;;  %vm299_vm2 = vweird.f32 %v293_v10 }
  0xd7   :  { %v306_v18 = vor.u32 1.1754944e-38, %v305_v14  ;;  %vm304_vm4 = vcmp.eq.f32.partialorder %v303_v16, 8.507059e+37 }
  0xdb   :  { %v378_v11 = vpop.eup %377 }
  0xdc   :  { %v295_v12 = vmul.f32 %v378_v11, %v293_v10  ;;  %vm300_vm1 = vweird.f32 %v378_v11 }
  0xdd   :  { %vm301_vm3 = vmor %vm299_vm2, %vm300_vm1 }
  0xde   :  { %v296_v13 = vsub.f32 1.0, %v295_v12 }
  0xe0   :  { %v297_v15 = vmul.f32 %v378_v11, %v296_v13 }
  0xe2   :  { %v298_v17 = vadd.f32 %v378_v11, %v297_v15 }
  0xe4   :  { %v302_v19 = vsel %vm301_vm3, %v378_v11, %v298_v17 }
  0xe5   :  { %v307_v20 = vsel %vm304_vm4, %v306_v18, %v302_v19 }
  0xe6   :  { %345 = vmatmul.f32.vlgmr.msrb.gmra.mxu3 %v307_v20 }
 0x169   :  { %v346_v22 = vpop.f32.mrf.mxu3 }
 0x16a   :  { %v347_v23 = vadd.f32 %v374_v21, %v346_v22 }
 0x16c   :  { %349 = vst.msk [vmem:[#allocation5] sm:$0xff] %vm146_vm0, %v347_v23 }
 0x16d   :  { %360 = dma.vmem_to_hbm [thread:$0]  %s356_s20, 128, %s358_s23, [#allocation4]  }
 0x16e   :  { %429 = dma.done.wait [#allocation4], 128  }
 0x16f   :  { %430 = vsyncadd [#allocation4], 4294967168 }
 0x170   :  { %365 = vsyncpa [#allocation3], 1 }
 0x171   :  { %366 = vsyncpa [#allocation4], 1 }

</bundles_post_ra>
